<compile_context>
chip_gen: v6e
topology: v6e:2x2x1
jax: 0.10.0
libtpu: 0.0.40
codegen_flags: <defaults>
</compile_context>

<pallas_src>
import jax
import jax.numpy as jnp
from jax.experimental import pallas as pl
from jax.experimental.pallas import tpu as pltpu

IN_DIM = 28 * 28      # 784
HIDDEN = 64
LATENT = 32
PAD = 128             # lane-pad hidden/latent dims to one full vreg lane width
COMPUTE_DTYPE = jnp.bfloat16


def _autoencoder_kernel(x_ref,
                        w1_ref, b1_ref,
                        w23_ref, b23_ref,
                        w4_ref, b4_ref,
                        out_ref):
    # encoder: Linear(784 -> hidden) + ReLU   (hidden padded to 128 lanes).
    # Kept in f32: the K=784 contraction dominates rounding error and the MXU
    # work is hidden under the HBM DMA anyway.
    h = jnp.dot(x_ref[...], w1_ref[...],
                preferred_element_type=jnp.float32) + b1_ref[...]
    h = jnp.maximum(h, 0.0)

    # fused [fc_latent ∘ decoder Linear(latent -> hidden)] + ReLU.
    # Exact fusion (no nonlinearity between the two layers); rank <= latent.
    d = jnp.dot(h.astype(w23_ref.dtype), w23_ref[...],
                preferred_element_type=jnp.float32) + b23_ref[...]
    d = jnp.maximum(d, 0.0)

    # decoder: Linear(hidden -> 784) + Sigmoid
    o = jnp.dot(d.astype(w4_ref.dtype), w4_ref[...],
                preferred_element_type=jnp.float32) + b4_ref[...]

    # Numerically stable sigmoid: exp(-|o|) never overflows; the divide is an
    # approximate reciprocal on the EUP instead of a VPU f32 divide.
    e = jnp.exp(-jnp.abs(o))
    inv = pl.reciprocal(1.0 + e, approx=True)
    out_ref[...] = jnp.where(o >= 0.0, inv, e * inv).astype(out_ref.dtype)


def _round_up(n, m):
    return ((n + m - 1) // m) * m


def _cdiv(a, b):
    return (a + b - 1) // b


def _device_budget():
    """(max block rows, vmem_limit_bytes) per chip generation."""
    try:
        kind = jax.devices()[0].device_kind.lower()
    except Exception:
        kind = ""
    if "v6" in kind or "trillium" in kind:
        # 128 MiB VMEM, high HBM BW: 2048-row tiles already sit at the HBM
        # roofline; bigger only adds VMEM pressure.
        return 2048, 96 << 20
    # v5e (lower HBM BW) / v7x (64 MiB VMEM per TC) / unknown: stay moderate.
    # At bm=1024 the double-buffered, 896-lane-padded f32 in/out tiles are
    # ~14.7 MiB total; 48 MiB leaves ample headroom for f32 epilogue temps.
    return 1024, 48 << 20


def _pick_block_rows(batch, target):
    """Rows of the flattened activation matrix processed per grid step.

    Aims for ~8 grid steps (so in-DMA / compute / out-DMA overlap and both
    v7x TensorCores get work), clamped to [256, target], and guarantees at
    least 2 steps whenever batch > 256 rows.
    """
    full = _round_up(batch, 8)
    if full <= 256:
        return full                      # too small to pipeline usefully
    bm = _round_up(_cdiv(batch, 8), 8)   # ~8 pipeline stages
    bm = max(bm, 256)                    # keep per-step overhead negligible
    bm = min(bm, target)                 # per-chip VMEM budget
    bm = min(bm, _round_up(_cdiv(batch, 2), 8))   # >= 2 steps (v7x: 2 TCs)
    return bm


def init_params(key, hidden_dim=HIDDEN, latent_dim=LATENT):
    """f32 params.  Weights stored pre-transposed as (in, out); biases (1, out)."""
    def linear(k, fan_in, fan_out):
        kw, kb = jax.random.split(k)
        bound = 1.0 / jnp.sqrt(fan_in)   # PyTorch default init
        w = jax.random.uniform(kw, (fan_in, fan_out), jnp.float32, -bound, bound)
        b = jax.random.uniform(kb, (1, fan_out), jnp.float32, -bound, bound)
        return w, b

    k1, k2, k3, k4 = jax.random.split(key, 4)
    w1, b1 = linear(k1, IN_DIM, hidden_dim)      # encoder Linear(784, hidden)
    w2, b2 = linear(k2, hidden_dim, latent_dim)  # fc_latent
    w3, b3 = linear(k3, latent_dim, hidden_dim)  # decoder Linear(latent, hidden)
    w4, b4 = linear(k4, hidden_dim, IN_DIM)      # decoder Linear(hidden, 784)
    return (w1, b1, w2, b2, w3, b3, w4, b4)


def prepare_params(params, compute_dtype=COMPUTE_DTYPE):
    """Fuse the two unactivated middle layers, pad hidden dims to 128 lanes,
    and cast the small matmuls to the MXU dtype.

    Zero-padding is exact: padded output columns get zero bias, stay zero
    through ReLU, and the matching padded input rows of the next weight are
    zero, so they contribute nothing.
    """
    w1, b1, w2, b2, w3, b3, w4, b4 = params

    # Algebraic fusion of fc_latent and decoder[0] (done once, in f32):
    #   relu((h @ w2 + b2) @ w3 + b3) == relu(h @ (w2 @ w3) + (b2 @ w3 + b3))
    w23 = w2 @ w3          # (hidden, hidden), rank <= latent
    b23 = b2 @ w3 + b3     # (1, hidden)

    def pad_to(a, shape):
        return jnp.pad(a, [(0, s - d) for d, s in zip(a.shape, shape)])

    w1p = pad_to(w1, (IN_DIM, PAD)).astype(jnp.float32)   # f32 for K=784 accuracy
    b1p = pad_to(b1, (1, PAD))
    w23p = pad_to(w23, (PAD, PAD)).astype(compute_dtype)
    b23p = pad_to(b23, (1, PAD))
    w4p = pad_to(w4, (PAD, IN_DIM)).astype(compute_dtype)
    b4p = b4
    return (w1p, b1p, w23p, b23p, w4p, b4p)


def autoencoder_forward(x_nchw, prepared_params):
    """x_nchw: (B, 1, 28, 28) float32 -> (B, 1, 28, 28) float32."""
    B = x_nchw.shape[0]
    x_flat = x_nchw.reshape(B, IN_DIM)            # nn.Flatten()

    w1, b1, w23, b23, w4, b4 = prepared_params

    target_bm, vmem_limit = _device_budget()
    bm = _pick_block_rows(B, target_bm)
    grid = (pl.cdiv(B, bm),)

    def const_spec(shape):
        # Full-array block with a constant index_map: stays VMEM-resident
        # across all grid steps.  Total weight footprint (even double
        # buffered) is < 1.3 MiB after the layer fusion, so no special
        # buffering control is needed.
        return pl.BlockSpec(shape, lambda i: (0, 0))

    in_specs = [
        pl.BlockSpec((bm, IN_DIM), lambda i: (i, 0)),   # x streams over batch
        const_spec(w1.shape), const_spec(b1.shape),
        const_spec(w23.shape), const_spec(b23.shape),
        const_spec(w4.shape), const_spec(b4.shape),
    ]
    out_specs = pl.BlockSpec((bm, IN_DIM), lambda i: (i, 0))

    flops = 2 * B * (IN_DIM * PAD + PAD * PAD + PAD * IN_DIM)
    weight_bytes = sum(int(a.size) * a.dtype.itemsize
                       for a in (w1, b1, w23, b23, w4, b4))
    cost = pl.CostEstimate(
        flops=flops,
        transcendentals=B * IN_DIM,                      # one exp per output elem
        bytes_accessed=2 * B * IN_DIM * 4 + weight_bytes,
    )

    out_flat = pl.pallas_call(
        _autoencoder_kernel,
        out_shape=jax.ShapeDtypeStruct((B, IN_DIM), jnp.float32),
        grid=grid,
        in_specs=in_specs,
        out_specs=out_specs,
        compiler_params=pltpu.CompilerParams(
            dimension_semantics=("parallel",),   # batch blocks across TCs on v7x
            vmem_limit_bytes=vmem_limit,
        ),
        cost_estimate=cost,
    )(x_flat, w1, b1, w23, b23, w4, b4)

    return out_flat.reshape(B, 1, 28, 28)        # out.view(-1, 1, 28, 28)


def autoencoder_reference(x_nchw, params):
    """Pure-JAX f32 reference matching the PyTorch module (unfused)."""
    w1, b1, w2, b2, w3, b3, w4, b4 = params
    x = x_nchw.reshape(x_nchw.shape[0], IN_DIM)
    h = jnp.maximum(x @ w1 + b1, 0.0)
    z = h @ w2 + b2
    d = jnp.maximum(z @ w3 + b3, 0.0)
    o = d @ w4 + b4
    return jax.nn.sigmoid(o).reshape(-1, 1, 28, 28)


if __name__ == "__main__":
    key = jax.random.PRNGKey(0)
    k_params, k_x = jax.random.split(key)

    params = init_params(k_params)
    prepared = prepare_params(params)

    x = jax.random.normal(k_x, (8, 1, 28, 28), dtype=jnp.float32)

    out = jax.jit(autoencoder_forward)(x, prepared)
    out = jax.block_until_ready(out)
    ref = autoencoder_reference(x, params)

    assert out.shape == (8, 1, 28, 28), out.shape
    assert out.dtype == jnp.float32
    assert bool(jnp.all(jnp.isfinite(out)))
    # f32 first matmul + bf16 fused middle/last matmuls + approx reciprocal
    err = float(jnp.max(jnp.abs(out - ref)))
    assert err < 5e-3, err
    print("KERNEL_OK")
</pallas_src>

<mosaic_0001>
module attributes {stable_mosaic.version = 11 : i64} {
  func.func @_autoencoder_kernel(%arg0: i32, %arg1: memref<8x784xf32, #tpu.memory_space<vmem>>, %arg2: memref<784x128xf32, #tpu.memory_space<vmem>>, %arg3: memref<1x128xf32, #tpu.memory_space<vmem>>, %arg4: memref<128x128xbf16, #tpu.memory_space<vmem>>, %arg5: memref<1x128xf32, #tpu.memory_space<vmem>>, %arg6: memref<128x784xbf16, #tpu.memory_space<vmem>>, %arg7: memref<1x784xf32, #tpu.memory_space<vmem>>, %arg8: memref<8x784xf32, #tpu.memory_space<vmem>>) attributes {dimension_semantics = [#tpu.dimension_semantics<parallel>], iteration_bounds = array<i64: 1>, scalar_prefetch = 0 : i64, scratch_operands = 0 : i64, tpu.core_type = #tpu.core_type<tc>, window_params = [{transform_indices = @transform_0, window_bounds = array<i64: 8, 784>}, {pipeline_mode = #tpu.pipeline_mode<synchronous>, transform_indices = @transform_1, window_bounds = array<i64: 784, 128>}, {pipeline_mode = #tpu.pipeline_mode<synchronous>, transform_indices = @transform_2, window_bounds = array<i64: 1, 128>}, {pipeline_mode = #tpu.pipeline_mode<synchronous>, transform_indices = @transform_3, window_bounds = array<i64: 128, 128>}, {pipeline_mode = #tpu.pipeline_mode<synchronous>, transform_indices = @transform_4, window_bounds = array<i64: 1, 128>}, {pipeline_mode = #tpu.pipeline_mode<synchronous>, transform_indices = @transform_5, window_bounds = array<i64: 128, 784>}, {pipeline_mode = #tpu.pipeline_mode<synchronous>, transform_indices = @transform_6, window_bounds = array<i64: 1, 784>}, {transform_indices = @transform_7, window_bounds = array<i64: 8, 784>}]} {
    %c0 = arith.constant 0 : index
    %c0_0 = arith.constant 0 : index
    %0 = vector.load %arg1[%c0, %c0_0] : memref<8x784xf32, #tpu.memory_space<vmem>>, vector<8x784xf32>
    %c0_1 = arith.constant 0 : index
    %c0_2 = arith.constant 0 : index
    %1 = vector.load %arg2[%c0_1, %c0_2] : memref<784x128xf32, #tpu.memory_space<vmem>>, vector<784x128xf32>
    %cst = arith.constant dense<0.000000e+00> : vector<8x128xf32>
    %2 = tpu.matmul %0, %1, %cst {dimension_numbers = #tpu.dot_dimension_numbers<[1], [0], [0], [1], [0, 0, 1, 1], [], []>} : vector<8x784xf32>, vector<784x128xf32>, vector<8x128xf32> -> vector<8x128xf32>
    %c0_3 = arith.constant 0 : index
    %c0_4 = arith.constant 0 : index
    %3 = vector.load %arg3[%c0_3, %c0_4] : memref<1x128xf32, #tpu.memory_space<vmem>>, vector<1x128xf32>
    %4 = vector.broadcast %3 : vector<1x128xf32> to vector<8x128xf32>
    %5 = arith.addf %2, %4 : vector<8x128xf32>
    %cst_5 = arith.constant 0.000000e+00 : f32
    %6 = vector.broadcast %cst_5 : f32 to vector<8x128xf32>
    %7 = arith.maximumf %5, %6 : vector<8x128xf32>
    %8 = arith.truncf %7 : vector<8x128xf32> to vector<8x128xbf16>
    %c0_6 = arith.constant 0 : index
    %c0_7 = arith.constant 0 : index
    %9 = vector.load %arg4[%c0_6, %c0_7] : memref<128x128xbf16, #tpu.memory_space<vmem>>, vector<128x128xbf16>
    %cst_8 = arith.constant dense<0.000000e+00> : vector<8x128xf32>
    %10 = tpu.matmul %8, %9, %cst_8 {dimension_numbers = #tpu.dot_dimension_numbers<[1], [0], [0], [1], [0, 0, 1, 1], [], []>} : vector<8x128xbf16>, vector<128x128xbf16>, vector<8x128xf32> -> vector<8x128xf32>
    %c0_9 = arith.constant 0 : index
    %c0_10 = arith.constant 0 : index
    %11 = vector.load %arg5[%c0_9, %c0_10] : memref<1x128xf32, #tpu.memory_space<vmem>>, vector<1x128xf32>
    %12 = vector.broadcast %11 : vector<1x128xf32> to vector<8x128xf32>
    %13 = arith.addf %10, %12 : vector<8x128xf32>
    %cst_11 = arith.constant 0.000000e+00 : f32
    %14 = vector.broadcast %cst_11 : f32 to vector<8x128xf32>
    %15 = arith.maximumf %13, %14 : vector<8x128xf32>
    %16 = arith.truncf %15 : vector<8x128xf32> to vector<8x128xbf16>
    %c0_12 = arith.constant 0 : index
    %c0_13 = arith.constant 0 : index
    %17 = vector.load %arg6[%c0_12, %c0_13] : memref<128x784xbf16, #tpu.memory_space<vmem>>, vector<128x784xbf16>
    %cst_14 = arith.constant dense<0.000000e+00> : vector<8x784xf32>
    %18 = tpu.matmul %16, %17, %cst_14 {dimension_numbers = #tpu.dot_dimension_numbers<[1], [0], [0], [1], [0, 0, 1, 1], [], []>} : vector<8x128xbf16>, vector<128x784xbf16>, vector<8x784xf32> -> vector<8x784xf32>
    %c0_15 = arith.constant 0 : index
    %c0_16 = arith.constant 0 : index
    %19 = vector.load %arg7[%c0_15, %c0_16] : memref<1x784xf32, #tpu.memory_space<vmem>>, vector<1x784xf32>
    %20 = vector.broadcast %19 : vector<1x784xf32> to vector<8x784xf32>
    %21 = arith.addf %18, %20 : vector<8x784xf32>
    %22 = math.absf %21 : vector<8x784xf32>
    %cst_17 = arith.constant 0.000000e+00 : f32
    %23 = vector.broadcast %cst_17 : f32 to vector<8x784xf32>
    %24 = arith.subf %23, %22 : vector<8x784xf32>
    %25 = math.exp %24 : vector<8x784xf32>
    %cst_18 = arith.constant 1.000000e+00 : f32
    %26 = vector.broadcast %cst_18 : f32 to vector<8x784xf32>
    %27 = arith.addf %26, %25 : vector<8x784xf32>
    %28 = tpu.reciprocal %27 {approx = true} : vector<8x784xf32> -> vector<8x784xf32>
    %cst_19 = arith.constant 0.000000e+00 : f32
    %29 = vector.broadcast %cst_19 : f32 to vector<8x784xf32>
    %30 = arith.cmpf oge, %21, %29 : vector<8x784xf32>
    %31 = arith.mulf %25, %28 : vector<8x784xf32>
    %32 = arith.select %30, %28, %31 : vector<8x784xi1>, vector<8x784xf32>
    %c0_20 = arith.constant 0 : index
    %c0_21 = arith.constant 0 : index
    %33 = vector.load %arg8[%c0_20, %c0_21] : memref<8x784xf32, #tpu.memory_space<vmem>>, vector<8x784xf32>
    tpu.vector_store %arg8[%c0_20, %c0_21], %32 {strides = array<i32>} : memref<8x784xf32, #tpu.memory_space<vmem>>, vector<8x784xf32>,
    return
  }
  func.func @transform_0(%arg0: i32) -> (i32, i32) {
    %c0_i32 = arith.constant 0 : i32
    %c0_i32_0 = arith.constant 0 : i32
    return %arg0, %c0_i32 : i32, i32
  }
  func.func @transform_1(%arg0: i32) -> (i32, i32) {
    %c0_i32 = arith.constant 0 : i32
    %c0_i32_0 = arith.constant 0 : i32
    %c0_i32_1 = arith.constant 0 : i32
    return %c0_i32, %c0_i32_0 : i32, i32
  }
  func.func @transform_2(%arg0: i32) -> (i32, i32) {
    %c0_i32 = arith.constant 0 : i32
    %c0_i32_0 = arith.constant 0 : i32
    %c0_i32_1 = arith.constant 0 : i32
    return %c0_i32, %c0_i32_0 : i32, i32
  }
  func.func @transform_3(%arg0: i32) -> (i32, i32) {
    %c0_i32 = arith.constant 0 : i32
    %c0_i32_0 = arith.constant 0 : i32
    %c0_i32_1 = arith.constant 0 : i32
    return %c0_i32, %c0_i32_0 : i32, i32
  }
  func.func @transform_4(%arg0: i32) -> (i32, i32) {
    %c0_i32 = arith.constant 0 : i32
    %c0_i32_0 = arith.constant 0 : i32
    %c0_i32_1 = arith.constant 0 : i32
    return %c0_i32, %c0_i32_0 : i32, i32
  }
  func.func @transform_5(%arg0: i32) -> (i32, i32) {
    %c0_i32 = arith.constant 0 : i32
    %c0_i32_0 = arith.constant 0 : i32
    %c0_i32_1 = arith.constant 0 : i32
    return %c0_i32, %c0_i32_0 : i32, i32
  }
  func.func @transform_6(%arg0: i32) -> (i32, i32) {
    %c0_i32 = arith.constant 0 : i32
    %c0_i32_0 = arith.constant 0 : i32
    %c0_i32_1 = arith.constant 0 : i32
    return %c0_i32, %c0_i32_0 : i32, i32
  }
  func.func @transform_7(%arg0: i32) -> (i32, i32) {
    %c0_i32 = arith.constant 0 : i32
    %c0_i32_0 = arith.constant 0 : i32
    return %arg0, %c0_i32 : i32, i32
  }
}

</mosaic_0001>

<bundles_post_ra>
// kernel: autoencoder_forward.1
= control target key start
LH: loop header
LB: loop body
LE: loop exit
PB: predicated region body
PF: predicated region fallthrough
CT: control target
= control target key end

     0   :  { %vm139_vm0 = vcmask 130048   ;;  %vm1524_vm1 = vmmov 0   ;;  %s2145_s1 = inlined_call_operand.vmem [shape: f32[784,128], index: 1, kind: input, shape index: {}]   ;;  %s2146_s0 = inlined_call_operand.vmem [shape: f32[8,784], index: 0, kind: input, shape index: {}]   ;;  %s2147_s3 = inlined_call_operand.vmem [shape: bf16[128,128], index: 3, kind: input, shape index: {}]   ;;  %s2148_s5 = inlined_call_operand.vmem [shape: bf16[128,784], index: 5, kind: input, shape index: {}]   ;;  %s2149_s2 = inlined_call_operand.vmem [shape: f32[1,128], index: 2, kind: input, shape index: {}]   ;;  %s2150_s4 = inlined_call_operand.vmem [shape: f32[1,128], index: 4, kind: input, shape index: {}]   ;;  %s2151_s6 = inlined_call_operand.vmem [shape: f32[1,784], index: 6, kind: input, shape index: {}]   ;;  %s2152_s7 = inlined_call_operand.vmem [shape: f32[8,784], index: 7, kind: output, shape index: {}]  }
   0x1   :  { %v65_v0 = vld [vmem:[%s2145_s1 + $0xf8] sm:$0xff]  ;;  %v64_v2 = vld [vmem:[%s2145_s1 + $0xf0] sm:$0xff]  ;;  %v63_v6 = vld [vmem:[%s2145_s1 + $0xe8] sm:$0xff] }
   0x2   :  { %v49_v1 = vld [vmem:[%s2145_s1 + $0x78] sm:$0xff]  ;;  %1231 = vmatprep.subr.mxu0 %v65_v0  ;;  %v48_v4 = vld [vmem:[%s2145_s1 + $0x70] sm:$0xff]  ;;  %v47_v8 = vld [vmem:[%s2145_s1 + $0x68] sm:$0xff] }
   0x3   :  { %v97_v3 = vld [vmem:[%s2145_s1 + $0x1f8] sm:$0xff]  ;;  %1232 = vmatpush3.msra.mxu0 %v49_v1  ;;  %v96_v7 = vld [vmem:[%s2145_s1 + $0x1f0] sm:$0xff]  ;;  %v95_v10 = vld [vmem:[%s2145_s1 + $0x1e8] sm:$0xff] }
   0x4   :  { %v81_v5 = vld [vmem:[%s2145_s1 + $0x178] sm:$0xff]  ;;  %1266 = vmatprep.subr.mxu1 %v97_v3  ;;  %1233 = vmatprep.subr.mxu0 %v64_v2  ;;  %v80_v9 = vld [vmem:[%s2145_s1 + $0x170] sm:$0xff]  ;;  %v62_v11 = vld [vmem:[%s2145_s1 + $0xe0] sm:$0xff] }
   0x5   :  { %1267 = vmatpush3.msra.mxu1 %v81_v5  ;;  %1234 = vmatpush3.msra.mxu0 %v48_v4  ;;  %v79_v12 = vld [vmem:[%s2145_s1 + $0x168] sm:$0xff]  ;;  %v46_v13 = vld [vmem:[%s2145_s1 + $0x60] sm:$0xff]  ;;  %v61_v15 = vld [vmem:[%s2145_s1 + $0xd8] sm:$0xff] }
   0x6   :  { %1268 = vmatprep.subr.mxu1 %v96_v7  ;;  %1235 = vmatprep.subr.mxu0 %v63_v6  ;;  %v94_v14 = vld [vmem:[%s2145_s1 + $0x1e0] sm:$0xff]  ;;  %v45_v17 = vld [vmem:[%s2145_s1 + $0x58] sm:$0xff]  ;;  %v60_v19 = vld [vmem:[%s2145_s1 + $0xd0] sm:$0xff] }
   0x7   :  { %1269 = vmatpush3.msra.mxu1 %v80_v9  ;;  %1236 = vmatpush3.msra.mxu0 %v47_v8  ;;  %v78_v16 = vld [vmem:[%s2145_s1 + $0x160] sm:$0xff]  ;;  %v93_v18 = vld [vmem:[%s2145_s1 + $0x1d8] sm:$0xff]  ;;  %v44_v21 = vld [vmem:[%s2145_s1 + $0x50] sm:$0xff] }
   0x8   :  { %1270 = vmatprep.subr.mxu1 %v95_v10  ;;  %1237 = vmatprep.subr.mxu0 %v62_v11  ;;  %v77_v20 = vld [vmem:[%s2145_s1 + $0x158] sm:$0xff]  ;;  %v92_v22 = vld [vmem:[%s2145_s1 + $0x1d0] sm:$0xff]  ;;  %v59_v23 = vld [vmem:[%s2145_s1 + $0xc8] sm:$0xff] }
   0x9   :  { %1271 = vmatpush3.msra.mxu1 %v79_v12  ;;  %1238 = vmatpush3.msra.mxu0 %v46_v13  ;;  %v76_v24 = vld [vmem:[%s2145_s1 + $0x150] sm:$0xff]  ;;  %v43_v25 = vld [vmem:[%s2145_s1 + $0x48] sm:$0xff]  ;;  %v58_v27 = vld [vmem:[%s2145_s1 + $0xc0] sm:$0xff] }
   0xa   :  { %1272 = vmatprep.subr.mxu1 %v94_v14  ;;  %1239 = vmatprep.subr.mxu0 %v61_v15  ;;  %v91_v26 = vld [vmem:[%s2145_s1 + $0x1c8] sm:$0xff]  ;;  %v42_v29 = vld [vmem:[%s2145_s1 + $0x40] sm:$0xff]  ;;  %v57_v31 = vld [vmem:[%s2145_s1 + $0xb8] sm:$0xff]  ;;  %v1523_v14 = vmov 0.0  }
   0xb   :  { %1273 = vmatpush3.msra.mxu1 %v78_v16  ;;  %1240 = vmatpush3.msra.mxu0 %v45_v17  ;;  %v75_v28 = vld [vmem:[%s2145_s1 + $0x148] sm:$0xff]  ;;  %v90_v30 = vld [vmem:[%s2145_s1 + $0x1c0] sm:$0xff]  ;;  %v41_v33 = vld [vmem:[%s2145_s1 + $0x38] sm:$0xff] }
   0xc   :  { %1274 = vmatprep.subr.mxu1 %v93_v18  ;;  %1241 = vmatprep.subr.mxu0 %v60_v19  ;;  %v74_v32 = vld [vmem:[%s2145_s1 + $0x140] sm:$0xff]  ;;  %v89_v34 = vld [vmem:[%s2145_s1 + $0x1b8] sm:$0xff]  ;;  %v56_v35 = vld [vmem:[%s2145_s1 + $0xb0] sm:$0xff] }
   0xd   :  { %1275 = vmatpush3.msra.mxu1 %v77_v20  ;;  %1242 = vmatpush3.msra.mxu0 %v44_v21  ;;  %v73_v36 = vld [vmem:[%s2145_s1 + $0x138] sm:$0xff]  ;;  %v40_v37 = vld [vmem:[%s2145_s1 + $0x30] sm:$0xff]  ;;  %v55_v39 = vld [vmem:[%s2145_s1 + $0xa8] sm:$0xff] }
   0xe   :  { %1276 = vmatprep.subr.mxu1 %v92_v22  ;;  %1243 = vmatprep.subr.mxu0 %v59_v23  ;;  %v88_v38 = vld [vmem:[%s2145_s1 + $0x1b0] sm:$0xff]  ;;  %v39_v41 = vld [vmem:[%s2145_s1 + $0x28] sm:$0xff]  ;;  %v54_v43 = vld [vmem:[%s2145_s1 + $0xa0] sm:$0xff] }
   0xf   :  { %1277 = vmatpush3.msra.mxu1 %v76_v24  ;;  %1244 = vmatpush3.msra.mxu0 %v43_v25  ;;  %v72_v40 = vld [vmem:[%s2145_s1 + $0x130] sm:$0xff]  ;;  %v87_v42 = vld [vmem:[%s2145_s1 + $0x1a8] sm:$0xff]  ;;  %v38_v45 = vld [vmem:[%s2145_s1 + $0x20] sm:$0xff] }
  0x10   :  { %1278 = vmatprep.subr.mxu1 %v91_v26  ;;  %1245 = vmatprep.subr.mxu0 %v58_v27  ;;  %v71_v44 = vld [vmem:[%s2145_s1 + $0x128] sm:$0xff]  ;;  %v86_v46 = vld [vmem:[%s2145_s1 + $0x1a0] sm:$0xff]  ;;  %v53_v47 = vld [vmem:[%s2145_s1 + $0x98] sm:$0xff] }
  0x11   :  { %1279 = vmatpush3.msra.mxu1 %v75_v28  ;;  %1246 = vmatpush3.msra.mxu0 %v42_v29  ;;  %v70_v48 = vld [vmem:[%s2145_s1 + $0x120] sm:$0xff]  ;;  %v37_v49 = vld [vmem:[%s2145_s1 + $0x18] sm:$0xff]  ;;  %v52_v51 = vld [vmem:[%s2145_s1 + $0x90] sm:$0xff] }
  0x12   :  { %1280 = vmatprep.subr.mxu1 %v90_v30  ;;  %1247 = vmatprep.subr.mxu0 %v57_v31  ;;  %v85_v50 = vld [vmem:[%s2145_s1 + $0x198] sm:$0xff]  ;;  %v36_v53 = vld [vmem:[%s2145_s1 + $0x10] sm:$0xff]  ;;  %v51_v55 = vld [vmem:[%s2145_s1 + $0x88] sm:$0xff] }
  0x13   :  { %1281 = vmatpush3.msra.mxu1 %v74_v32  ;;  %1248 = vmatpush3.msra.mxu0 %v41_v33  ;;  %v69_v52 = vld [vmem:[%s2145_s1 + $0x118] sm:$0xff]  ;;  %v84_v54 = vld [vmem:[%s2145_s1 + $0x190] sm:$0xff]  ;;  %v35_v57 = vld [vmem:[%s2145_s1 + $0x8] sm:$0xff] }
  0x14   :  { %1282 = vmatprep.subr.mxu1 %v89_v34  ;;  %1249 = vmatprep.subr.mxu0 %v56_v35  ;;  %v68_v56 = vld [vmem:[%s2145_s1 + $0x110] sm:$0xff]  ;;  %v83_v58 = vld [vmem:[%s2145_s1 + $0x188] sm:$0xff]  ;;  %v50_v59 = vld [vmem:[%s2145_s1 + $0x80] sm:$0xff] }
  0x15   :  { %1283 = vmatpush3.msra.mxu1 %v73_v36  ;;  %1250 = vmatpush3.msra.mxu0 %v40_v37  ;;  %v28_v60 = vld [vmem:[%s2146_s0 + $0x8] sm:$0xff]  ;;  %v34_v61 = vld [vmem:[%s2145_s1] sm:$0xff]  ;;  %v129_v1 = vld [vmem:[%s2145_s1 + $0x2f8] sm:$0xff] }
  0x16   :  { %1284 = vmatprep.subr.mxu1 %v88_v38  ;;  %1251 = vmatprep.subr.mxu0 %v55_v39  ;;  %v67_v62 = vld [vmem:[%s2145_s1 + $0x108] sm:$0xff]  ;;  %v27_v63 = vld [vmem:[%s2146_s0] sm:$0xff]  ;;  %v30_v3 = vld [vmem:[%s2146_s0 + $0x18] sm:$0xff] }
  0x17   :  { %1285 = vmatpush3.msra.mxu1 %v72_v40  ;;  %1252 = vmatpush3.msra.mxu0 %v39_v41  ;;  %v82_v0 = vld [vmem:[%s2145_s1 + $0x180] sm:$0xff]  ;;  %v113_v4 = vld [vmem:[%s2145_s1 + $0x278] sm:$0xff]  ;;  %v29_v5 = vld [vmem:[%s2146_s0 + $0x10] sm:$0xff] }
  0x18   :  { %1286 = vmatprep.subr.mxu1 %v87_v42  ;;  %1253 = vmatprep.subr.mxu0 %v54_v43  ;;  %v66_v2 = vld [vmem:[%s2145_s1 + $0x100] sm:$0xff]  ;;  %v128_v6 = vld [vmem:[%s2145_s1 + $0x2f0] sm:$0xff]  ;;  %v32_v8 = vld [vmem:[%s2146_s0 + $0x28] sm:$0xff] }
  0x19   :  { %1287 = vmatpush3.msra.mxu1 %v71_v44  ;;  %1254 = vmatpush3.msra.mxu0 %v38_v45  ;;  %v112_v7 = vld [vmem:[%s2145_s1 + $0x270] sm:$0xff]  ;;  %v127_v9 = vld [vmem:[%s2145_s1 + $0x2e8] sm:$0xff]  ;;  %v126_v12 = vld [vmem:[%s2145_s1 + $0x2e0] sm:$0xff] }
  0x1a   :  { %1288 = vmatprep.subr.mxu1 %v86_v46  ;;  %1255 = vmatprep.subr.mxu0 %v53_v47  ;;  %v111_v10 = vld [vmem:[%s2145_s1 + $0x268] sm:$0xff]  ;;  %v110_v13 = vld [vmem:[%s2145_s1 + $0x260] sm:$0xff]  ;;  %v125_v16 = vld [vmem:[%s2145_s1 + $0x2d8] sm:$0xff] }
  0x1b   :  { %1289 = vmatpush3.msra.mxu1 %v70_v48  ;;  %1256 = vmatpush3.msra.mxu0 %v37_v49  ;;  %v131_v11 = vld [vmem:[%s2145_s1 + $0x308] sm:$0xff]  ;;  %v130_v15 = vld [vmem:[%s2145_s1 + $0x300] sm:$0xff]  ;;  %v109_v17 = vld [vmem:[%s2145_s1 + $0x258] sm:$0xff] }
  0x1c   :  { %1290 = vmatprep.subr.mxu1 %v85_v50  ;;  %1257 = vmatprep.subr.mxu0 %v52_v51  ;;  %v33_v18 = vld [vmem:[%s2146_s0 + $0x30] sm:$0xff]  ;;  %v123_v21 = vld [vmem:[%s2145_s1 + $0x2c8] sm:$0xff]  ;;  %v122_v23 = vld [vmem:[%s2145_s1 + $0x2c0] sm:$0xff] }
  0x1d   :  { %1291 = vmatpush3.msra.mxu1 %v69_v52  ;;  %1258 = vmatpush3.msra.mxu0 %v36_v53  ;;  %v124_v19 = vld [vmem:[%s2145_s1 + $0x2d0] sm:$0xff]  ;;  %v107_v22 = vld [vmem:[%s2145_s1 + $0x248] sm:$0xff]  ;;  %v106_v24 = vld [vmem:[%s2145_s1 + $0x240] sm:$0xff] }
  0x1e   :  { %1292 = vmatprep.subr.mxu1 %v84_v54  ;;  %1259 = vmatprep.subr.mxu0 %v51_v55  ;;  %v108_v20 = vld [vmem:[%s2145_s1 + $0x250] sm:$0xff]  ;;  %v121_v25 = vld [vmem:[%s2145_s1 + $0x2b8] sm:$0xff]  ;;  %v119_v29 = vld [vmem:[%s2145_s1 + $0x2a8] sm:$0xff] }
  0x1f   :  { %1293 = vmatpush3.msra.mxu1 %v68_v56  ;;  %1260 = vmatpush3.msra.mxu0 %v35_v57  ;;  %v105_v26 = vld [vmem:[%s2145_s1 + $0x238] sm:$0xff]  ;;  %v120_v27 = vld [vmem:[%s2145_s1 + $0x2b0] sm:$0xff]  ;;  %v103_v30 = vld [vmem:[%s2145_s1 + $0x228] sm:$0xff] }
  0x20   :  { %1294 = vmatprep.subr.mxu1 %v83_v58  ;;  %1261 = vmatprep.subr.mxu0 %v50_v59  ;;  %v104_v28 = vld [vmem:[%s2145_s1 + $0x230] sm:$0xff]  ;;  %v118_v31 = vld [vmem:[%s2145_s1 + $0x2a0] sm:$0xff]  ;;  %v117_v33 = vld [vmem:[%s2145_s1 + $0x298] sm:$0xff] }
  0x21   :  { %207 = vmatprep.mubr.f32.mxu0 %v28_v60  ;;  %1262 = vmatpush3.msra.mxu0 %v34_v61  ;;  %v102_v32 = vld [vmem:[%s2145_s1 + $0x220] sm:$0xff]  ;;  %v101_v34 = vld [vmem:[%s2145_s1 + $0x218] sm:$0xff]  ;;  %v116_v35 = vld [vmem:[%s2145_s1 + $0x290] sm:$0xff] }
  0x22   :  { %1295 = vmatpush3.msra.mxu1 %v67_v62  ;;  %208 = vmatmul.mubr.f32.vlgmr.msra.gmra.mxu0 %v27_v63  ;;  %v100_v36 = vld [vmem:[%s2145_s1 + $0x210] sm:$0xff]  ;;  %v115_v37 = vld [vmem:[%s2145_s1 + $0x288] sm:$0xff]  ;;  %v114_v39 = vld [vmem:[%s2145_s1 + $0x280] sm:$0xff] }
  0x23   :  { %1296 = vmatprep.subr.mxu1 %v82_v0  ;;  %1301 = vmatprep.subr.mxu0 %v129_v1  ;;  %v99_v38 = vld [vmem:[%s2145_s1 + $0x208] sm:$0xff]  ;;  %v98_v40 = vld [vmem:[%s2145_s1 + $0x200] sm:$0xff]  ;;  %v1407_v42 = vld [vmem:[%s2147_s3 + $0x38] sm:$0xff]  }
  0x24   :  { %1297 = vmatpush3.msra.mxu1 %v66_v2  ;;  %277 = vmatprep.mubr.f32.mxu1 %v30_v3  ;;  %v31_v41 = vld [vmem:[%s2146_s0 + $0x20] sm:$0xff]  ;;  %v1408_v43 = vld [vmem:[%s2147_s3 + $0x30] sm:$0xff]   ;;  %v1409_v44 = vld [vmem:[%s2147_s3 + $0x28] sm:$0xff]  }
  0x25   :  { %1302 = vmatpush3.msra.mxu0 %v113_v4  ;;  %278 = vmatmul.mubr.f32.vlgmr.msra.gmra.mxu1 %v29_v5  ;;  %v1410_v45 = vld [vmem:[%s2147_s3 + $0x20] sm:$0xff]   ;;  %v1411_v46 = vld [vmem:[%s2147_s3 + $0x18] sm:$0xff]   ;;  %v1412_v47 = vld [vmem:[%s2147_s3 + $0x10] sm:$0xff]  }
  0x26   :  { %1303 = vmatprep.subr.mxu0 %v128_v6  ;;  %347 = vmatprep.mubr.f32.mxu0 %v32_v8  ;;  %v1413_v48 = vld [vmem:[%s2147_s3 + $0x8] sm:$0xff]   ;;  %v1414_v49 = vld [vmem:[%s2147_s3] sm:$0xff]   ;;  %v1420_v52 = vld [vmem:[%s2148_s5 + $0x194] ss:$28 sps:$4 sm:$0xff]  }
  0x27   :  { %1304 = vmatpush3.msra.mxu0 %v112_v7  ;;  %1357 = vmatprep.subr.mxu1 %v1523_v14  ;;  %v1415_v50 = vld [vmem:[%s2148_s5 + $0x188] ss:$28 sps:$4 sm:$0xff]   ;;  %v1423_v53 = vld [vmem:[%s2148_s5 + $0x154] ss:$28 sps:$4 sm:$0xff]   ;;  %v1429_v55 = vld [vmem:[%s2148_s5 + $0x11c] ss:$28 sps:$4 sm:$0xff]  }
  0x28   :  { %1305 = vmatprep.subr.mxu0 %v127_v9  ;;  %1358 = vmatpush3.msra.mxu1 %v131_v11  ;;  %v1417_v51 = vld [vmem:[%s2148_s5 + $0x18c] ss:$28 sps:$4 sm:$0xff]   ;;  %v1427_v56 = vld [vmem:[%s2148_s5 + $0x118] ss:$28 sps:$4 sm:$0xff]   ;;  %v1435_v57 = vld [vmem:[%s2148_s5 + $0xe4] ss:$28 sps:$4 sm:$0xff]  }
  0x29   :  { %1306 = vmatpush3.msra.mxu0 %v111_v10  ;;  %1359 = vmatprep.subr.mxu1 %v1523_v14  ;;  %v1421_v54 = vld [vmem:[%s2148_s5 + $0x150] ss:$28 sps:$4 sm:$0xff]   ;;  %v1433_v58 = vld [vmem:[%s2148_s5 + $0xe0] ss:$28 sps:$4 sm:$0xff]   ;;  %v1439_v60 = vld [vmem:[%s2148_s5 + $0xa8] ss:$28 sps:$4 sm:$0xff]  }
  0x2a   :  { %1307 = vmatprep.subr.mxu0 %v126_v12  ;;  %1360 = vmatpush3.msra.mxu1 %v130_v15  ;;  %v1441_v59 = vld [vmem:[%s2148_s5 + $0xac] ss:$28 sps:$4 sm:$0xff]   ;;  %v1447_v61 = vld [vmem:[%s2148_s5 + $0x74] ss:$28 sps:$4 sm:$0xff]   ;;  %v1453_v63 = vld [vmem:[%s2148_s5 + $0x3c] ss:$28 sps:$4 sm:$0xff]  }
  0x2b   :  { %1308 = vmatpush3.msra.mxu0 %v110_v13  ;;  %1361 = vmatprep.mubr.msk.f32.mxu1 %vm1524_vm1, %v1523_v14  ;;  %v1445_v62 = vld [vmem:[%s2148_s5 + $0x70] ss:$28 sps:$4 sm:$0xff]   ;;  %v1451_v0 = vld [vmem:[%s2148_s5 + $0x38] ss:$28 sps:$4 sm:$0xff]   ;;  %v1164_v8 = vld [vmem:[%s2149_s2] ss:$0 sm:$0xff] }
  0x2c   :  { %1309 = vmatprep.subr.mxu0 %v125_v16  ;;  %1362 = vmatmul.mubr.msk.f32.vlgmr.msra.gmra.mxu1 %vm139_vm0, %v33_v18 }
  0x2d   :  { %1310 = vmatpush3.msra.mxu0 %v109_v17  ;;  %1364 = vmatprep.subr.bf16.mxu1 %v1523_v14 }
  0x2e   :  { %1311 = vmatprep.subr.mxu0 %v124_v19  ;;  %1380 = vmatprep.mubr.msk.bf16.mxu1 %vm1524_vm1, %v1523_v14  ;;  %v1418_v19 = vld [vmem:[%s2148_s5 + $0x190] ss:$28 sps:$4 sm:$0xff]  }
  0x2f   :  { %1312 = vmatpush3.msra.mxu0 %v108_v20  ;;  %1365 = vmatpush3.bf16.msra.mxu1 %v1407_v42 }
  0x30   :  { %1313 = vmatprep.subr.mxu0 %v123_v21  ;;  %1366 = vmatprep.subr.bf16.mxu1 %v1523_v14  ;;  %v1426_v21 = vld [vmem:[%s2148_s5 + $0x15c] ss:$28 sps:$4 sm:$0xff]  }
  0x31   :  { %1314 = vmatpush3.msra.mxu0 %v107_v22  ;;  %v1424_v22 = vld [vmem:[%s2148_s5 + $0x158] ss:$28 sps:$4 sm:$0xff]  }
  0x32   :  { %1315 = vmatprep.subr.mxu0 %v122_v23  ;;  %v1432_v23 = vld [vmem:[%s2148_s5 + $0x124] ss:$28 sps:$4 sm:$0xff]  }
  0x33   :  { %1316 = vmatpush3.msra.mxu0 %v106_v24  ;;  %1367 = vmatpush3.bf16.msra.mxu1 %v1408_v43  ;;  %v1430_v24 = vld [vmem:[%s2148_s5 + $0x120] ss:$28 sps:$4 sm:$0xff]  }
  0x34   :  { %1317 = vmatprep.subr.mxu0 %v121_v25  ;;  %1368 = vmatprep.subr.bf16.mxu1 %v1523_v14  ;;  %v1438_v25 = vld [vmem:[%s2148_s5 + $0xec] ss:$28 sps:$4 sm:$0xff]  }
  0x35   :  { %1318 = vmatpush3.msra.mxu0 %v105_v26  ;;  %v1436_v26 = vld [vmem:[%s2148_s5 + $0xe8] ss:$28 sps:$4 sm:$0xff]  }
  0x36   :  { %1319 = vmatprep.subr.mxu0 %v120_v27  ;;  %v1444_v27 = vld [vmem:[%s2148_s5 + $0xb4] ss:$28 sps:$4 sm:$0xff]  }
  0x37   :  { %1320 = vmatpush3.msra.mxu0 %v104_v28  ;;  %1369 = vmatpush3.bf16.msra.mxu1 %v1409_v44  ;;  %v1442_v28 = vld [vmem:[%s2148_s5 + $0xb0] ss:$28 sps:$4 sm:$0xff]  }
  0x38   :  { %1321 = vmatprep.subr.mxu0 %v119_v29  ;;  %1370 = vmatprep.subr.bf16.mxu1 %v1523_v14  ;;  %v1450_v29 = vld [vmem:[%s2148_s5 + $0x7c] ss:$28 sps:$4 sm:$0xff]  }
  0x39   :  { %1322 = vmatpush3.msra.mxu0 %v103_v30  ;;  %v1448_v30 = vld [vmem:[%s2148_s5 + $0x78] ss:$28 sps:$4 sm:$0xff]  }
  0x3a   :  { %1323 = vmatprep.subr.mxu0 %v118_v31  ;;  %v1456_v31 = vld [vmem:[%s2148_s5 + $0x44] ss:$28 sps:$4 sm:$0xff]  }
  0x3b   :  { %1324 = vmatpush3.msra.mxu0 %v102_v32  ;;  %1371 = vmatpush3.bf16.msra.mxu1 %v1410_v45  ;;  %v1454_v32 = vld [vmem:[%s2148_s5 + $0x40] ss:$28 sps:$4 sm:$0xff]   ;;  %v1463_v45 = vld [vmem:[%s2148_s5 + $0x198] ss:$28 sps:$4 sm:$0xff]  }
  0x3c   :  { %1325 = vmatprep.subr.mxu0 %v117_v33  ;;  %1372 = vmatprep.subr.bf16.mxu1 %v1523_v14  ;;  %v1459_v33 = vld [vmem:[%s2148_s5 + $0x4] ss:$28 sps:$4 sm:$0xff]  }
  0x3d   :  { %1326 = vmatpush3.msra.mxu0 %v101_v34  ;;  %v1462_v34 = vld [vmem:[%s2148_s5 + $0xc] ss:$28 sps:$4 sm:$0xff]  }
  0x3e   :  { %1327 = vmatprep.subr.mxu0 %v116_v35  ;;  %v1457_v35 = vld [vmem:[%s2148_s5] ss:$28 sps:$4 sm:$0xff]  }
  0x3f   :  { %1328 = vmatpush3.msra.mxu0 %v100_v36  ;;  %1373 = vmatpush3.bf16.msra.mxu1 %v1411_v46  ;;  %v1460_v36 = vld [vmem:[%s2148_s5 + $0x8] ss:$28 sps:$4 sm:$0xff]   ;;  %v1466_v46 = vld [vmem:[%s2148_s5 + $0x1a0] ss:$28 sps:$4 sm:$0xff]  }
  0x40   :  { %1329 = vmatprep.subr.mxu0 %v115_v37  ;;  %1374 = vmatprep.subr.bf16.mxu1 %v1523_v14  ;;  %v1465_v37 = vld [vmem:[%s2148_s5 + $0x19c] ss:$28 sps:$4 sm:$0xff]  }
  0x41   :  { %1330 = vmatpush3.msra.mxu0 %v99_v38  ;;  %v1525_v38 = vmov 0  }
  0x42   :  { %1331 = vmatprep.subr.mxu0 %v114_v39  ;;  %v1166_v39 = vld [vmem:[%s2150_s4] ss:$0 sm:$0xff] }
  0x43   :  { %1332 = vmatpush3.msra.mxu0 %v98_v40  ;;  %1375 = vmatpush3.bf16.msra.mxu1 %v1412_v47 }
  0x44   :  { %348 = vmatmul.mubr.f32.vlgmr.msra.gmra.mxu0 %v31_v41  ;;  %1376 = vmatprep.subr.bf16.mxu1 %v1523_v14 }
  0x45   :  { %927 = vmatprep.subr.bf16.mxu0 %v1417_v51  ;;  %959 = vmatprep.mubr.bf16.mxu0 %v1525_v38  ;;  %v1470_v51 = vld [vmem:[%s2148_s5 + $0x168] ss:$28 sps:$4 sm:$0xff]  }
  0x46   :  { %928 = vmatpush1.bf16.msra.mxu0 %v1415_v50  ;;  %v1467_v50 = vld [vmem:[%s2148_s5 + $0x160] ss:$28 sps:$4 sm:$0xff]  }
  0x47   :  { %1377 = vmatpush3.bf16.msra.mxu1 %v1413_v48  ;;  %929 = vmatprep.subr.bf16.mxu0 %v1423_v53  ;;  %v1469_v48 = vld [vmem:[%s2148_s5 + $0x164] ss:$28 sps:$4 sm:$0xff]  }
  0x48   :  { %1378 = vmatprep.subr.bf16.mxu1 %v1523_v14  ;;  %v1471_v53 = vld [vmem:[%s2148_s5 + $0x128] ss:$28 sps:$4 sm:$0xff]  }
  0x4a   :  { %930 = vmatpush1.bf16.msra.mxu0 %v1421_v54  ;;  %v1474_v54 = vld [vmem:[%s2148_s5 + $0x130] ss:$28 sps:$4 sm:$0xff]  }
  0x4b   :  { %1379 = vmatpush3.bf16.msra.mxu1 %v1414_v49  ;;  %931 = vmatprep.subr.bf16.mxu0 %v1429_v55  ;;  %v1477_v55 = vld [vmem:[%s2148_s5 + $0xf4] ss:$28 sps:$4 sm:$0xff]  }
  0x4c   :  { %968 = vmatprep.subr.bf16.mxu1 %v1420_v52  ;;  %v1473_v52 = vld [vmem:[%s2148_s5 + $0x12c] ss:$28 sps:$4 sm:$0xff]  }
  0x4e   :  { %932 = vmatpush1.bf16.msra.mxu0 %v1427_v56  ;;  %v1475_v56 = vld [vmem:[%s2148_s5 + $0xf0] ss:$28 sps:$4 sm:$0xff]  }
  0x4f   :  { %933 = vmatprep.subr.bf16.mxu0 %v1435_v57  ;;  %v1478_v57 = vld [vmem:[%s2148_s5 + $0xf8] ss:$28 sps:$4 sm:$0xff]  }
  0x52   :  { %934 = vmatpush1.bf16.msra.mxu0 %v1433_v58  ;;  %v1481_v58 = vld [vmem:[%s2148_s5 + $0xbc] ss:$28 sps:$4 sm:$0xff]  }
  0x53   :  { %935 = vmatprep.subr.bf16.mxu0 %v1441_v59  ;;  %v1479_v59 = vld [vmem:[%s2148_s5 + $0xb8] ss:$28 sps:$4 sm:$0xff]  }
  0x56   :  { %936 = vmatpush1.bf16.msra.mxu0 %v1439_v60  ;;  %v1482_v60 = vld [vmem:[%s2148_s5 + $0xc0] ss:$28 sps:$4 sm:$0xff]  }
  0x57   :  { %937 = vmatprep.subr.bf16.mxu0 %v1447_v61  ;;  %v1485_v61 = vld [vmem:[%s2148_s5 + $0x84] ss:$28 sps:$4 sm:$0xff]  }
  0x5a   :  { %938 = vmatpush1.bf16.msra.mxu0 %v1445_v62  ;;  %v1483_v62 = vld [vmem:[%s2148_s5 + $0x80] ss:$28 sps:$4 sm:$0xff]  }
  0x5b   :  { %939 = vmatprep.subr.bf16.mxu0 %v1453_v63  ;;  %v1486_v63 = vld [vmem:[%s2148_s5 + $0x88] ss:$28 sps:$4 sm:$0xff]  }
  0x5e   :  { %940 = vmatpush1.bf16.msra.mxu0 %v1451_v0  ;;  %v1489_v0 = vld [vmem:[%s2148_s5 + $0x4c] ss:$28 sps:$4 sm:$0xff]  }
  0x5f   :  { %941 = vmatprep.subr.bf16.mxu0 %v1459_v33 }
  0x62   :  { %942 = vmatpush1.bf16.msra.mxu0 %v1457_v35 }
  0x63   :  { %1009 = vmatprep.subr.bf16.mxu0 %v1465_v37 }
  0xe2   :  { %v1263_v5 = vpop.f32.mrf.mxu0 }
  0xe4   :  { %v1264_v6 = vpop.f32.mrf.mxu0 }
  0xe5   :  { %v1298_v1 = vpop.f32.mrf.mxu1  ;;  %v1265_v7 = vadd.f32 %v1264_v6, %v1263_v5  ;;  %v1494_v5 = vld [vmem:[%s2148_s5 + $0x18] ss:$28 sps:$4 sm:$0xff]   ;;  %v604_v6 = vlaneseq }
  0xe7   :  { %v1299_v2 = vpop.f32.mrf.mxu1  ;;  %v210_v9 = vadd.f32 %v1265_v7, %v1164_v8  ;;  %v605_v7 = vshrl.u32 %v604_v6, 7 }
  0xe8   :  { %v1300_v10 = vadd.f32 %v1299_v2, %v1298_v1  ;;  %v1487_v1 = vld [vmem:[%s2148_s5 + $0x48] ss:$28 sps:$4 sm:$0xff]   ;;  %v1490_v2 = vld [vmem:[%s2148_s5 + $0x50] ss:$28 sps:$4 sm:$0xff]  }
  0xe9   :  { %v606_v8 = vsub.s32 0, %v605_v7 }
  0xea   :  { %v280_v13 = vadd.f32 %v1300_v10, %v210_v9  ;;  %v614_v9 = vsub.s32 2, %v605_v7  ;;  %v602_v10 = vld [vmem:[%s2151_s6] sm:$0x7f] }
  0xec   :  { %v419_v3 = vpop.f32.mrf.mxu1 }
  0xee   :  { %v1363_v4 = vpop.f32.mrf.mxu1 }
  0xef   :  { %v1491_v4 = vld [vmem:[%s2148_s5 + $0x10] ss:$28 sps:$4 sm:$0xff]  }
 0x104   :  { %v1333_v11 = vpop.f32.mrf.mxu0 }
 0x106   :  { %v1334_v12 = vpop.f32.mrf.mxu0 }
 0x107   :  { %v1335_v15 = vadd.f32 %v1334_v12, %v1333_v11  ;;  %v610_v11 = vsub.s32 1, %v605_v7  ;;  %v618_v12 = vsub.s32 3, %v605_v7 }
 0x109   :  { %v350_v16 = vadd.f32 %v1335_v15, %v280_v13  ;;  %v607_v13 = vrot.slane %v602_v10, %v606_v8  ;;  %v615_v15 = vrot.slane %v602_v10, %v614_v9 }
 0x10b   :  { %v420_v17 = vadd.f32 %v419_v3, %v350_v16  ;;  %v1493_v3 = vld [vmem:[%s2148_s5 + $0x14] ss:$28 sps:$4 sm:$0xff]  }
 0x10d   :  { %v423_v18 = vmax.f32 %v420_v17, 0.0 }
 0x10f   :  { %v424_v20 = vpack.c.bf16 %v423_v18, %v423_v18  ;;  %v611_v18 = vrot.slane %v602_v10, %v610_v11 }
 0x111   :  { %1381 = vmatmul.mubr.bf16.vlgmr.msra.gmra.mxu1 %v424_v20 }
 0x112   :  { %969 = vmatpush1.bf16.msra.mxu1 %v1418_v19  ;;  %1000 = vmatprep.mubr.bf16.mxu1 %v1525_v38 }
 0x113   :  { %970 = vmatprep.subr.bf16.mxu1 %v1426_v21 }
 0x116   :  { %971 = vmatpush1.bf16.msra.mxu1 %v1424_v22 }
 0x117   :  { %972 = vmatprep.subr.bf16.mxu1 %v1432_v23 }
 0x11a   :  { %973 = vmatpush1.bf16.msra.mxu1 %v1430_v24 }
 0x11b   :  { %974 = vmatprep.subr.bf16.mxu1 %v1438_v25 }
 0x11e   :  { %975 = vmatpush1.bf16.msra.mxu1 %v1436_v26 }
 0x11f   :  { %976 = vmatprep.subr.bf16.mxu1 %v1444_v27 }
 0x122   :  { %977 = vmatpush1.bf16.msra.mxu1 %v1442_v28 }
 0x123   :  { %978 = vmatprep.subr.bf16.mxu1 %v1450_v29 }
 0x126   :  { %979 = vmatpush1.bf16.msra.mxu1 %v1448_v30 }
 0x127   :  { %980 = vmatprep.subr.bf16.mxu1 %v1456_v31 }
 0x12a   :  { %981 = vmatpush1.bf16.msra.mxu1 %v1454_v32 }
 0x12b   :  { %982 = vmatprep.subr.bf16.mxu1 %v1462_v34 }
 0x12e   :  { %983 = vmatpush1.bf16.msra.mxu1 %v1460_v36 }
 0x12f   :  { %1384 = vmatprep.subr.bf16.mxu1 %v1523_v14 }
 0x1d1   :  { %v530_v40 = vpop.f32.mrf.mxu1 }
 0x1d2   :  { %v531_v41 = vadd.f32 %v1166_v39, %v530_v40 }
 0x1d3   :  { %v1382_v42 = vpop.f32.mrf.mxu1 }
 0x1d4   :  { %v536_v43 = vmax.f32 %v531_v41, 0.0 }
 0x1d5   :  { %v533_v44 = vpop.f32.mrf.mxu1 }
 0x1d6   :  { %v537_v47 = vpack.c.bf16 %v536_v43, %v536_v43 }
 0x1d7   :  { %v1383_v49 = vpop.f32.mrf.mxu1 }
 0x1d8   :  { %960 = vmatmul.mubr.bf16.vlgmr.msra.gmra.mxu0 %v537_v47  ;;  %1001 = vmatmul.mubr.bf16.vlgmr.msra.gmra.mxu1 %v537_v47 }
 0x1d9   :  { %1010 = vmatpush1.bf16.msra.mxu0 %v1463_v45  ;;  %1385 = vmatpush3.bf16.msra.mxu1 %v1466_v46  ;;  %v622_v46 = vsub.s32 4, %v605_v7 }
 0x1da   :  { %1011 = vmatprep.subr.bf16.mxu0 %v1469_v48  ;;  %1386 = vmatprep.subr.bf16.mxu1 %v1523_v14 }
 0x1db   :  { %1041 = vmatprep.mubr.bf16.mxu0 %v1525_v38  ;;  %1400 = vmatprep.mubr.msk.bf16.mxu1 %vm1524_vm1, %v1523_v14 }
 0x1dd   :  { %1012 = vmatpush1.bf16.msra.mxu0 %v1467_v50  ;;  %1387 = vmatpush3.bf16.msra.mxu1 %v1470_v51  ;;  %v626_v51 = vsub.s32 5, %v605_v7 }
 0x1de   :  { %1013 = vmatprep.subr.bf16.mxu0 %v1473_v52  ;;  %1388 = vmatprep.subr.bf16.mxu1 %v1523_v14  ;;  %v623_v52 = vrot.slane %v602_v10, %v622_v46 }
 0x1e1   :  { %1014 = vmatpush1.bf16.msra.mxu0 %v1471_v53  ;;  %1389 = vmatpush3.bf16.msra.mxu1 %v1474_v54 }
 0x1e2   :  { %1015 = vmatprep.subr.bf16.mxu0 %v1477_v55  ;;  %1390 = vmatprep.subr.bf16.mxu1 %v1523_v14 }
 0x1e5   :  { %1016 = vmatpush1.bf16.msra.mxu0 %v1475_v56  ;;  %1391 = vmatpush3.bf16.msra.mxu1 %v1478_v57  ;;  %v627_v56 = vrot.slane %v602_v10, %v626_v51 }
 0x1e6   :  { %1017 = vmatprep.subr.bf16.mxu0 %v1481_v58  ;;  %1392 = vmatprep.subr.bf16.mxu1 %v1523_v14 }
 0x1e9   :  { %1018 = vmatpush1.bf16.msra.mxu0 %v1479_v59  ;;  %1393 = vmatpush3.bf16.msra.mxu1 %v1482_v60 }
 0x1ea   :  { %1019 = vmatprep.subr.bf16.mxu0 %v1485_v61  ;;  %1394 = vmatprep.subr.bf16.mxu1 %v1523_v14 }
 0x1ed   :  { %1020 = vmatpush1.bf16.msra.mxu0 %v1483_v62  ;;  %1395 = vmatpush3.bf16.msra.mxu1 %v1486_v63 }
 0x1ee   :  { %1021 = vmatprep.subr.bf16.mxu0 %v1489_v0  ;;  %1396 = vmatprep.subr.bf16.mxu1 %v1523_v14 }
 0x1f1   :  { %1022 = vmatpush1.bf16.msra.mxu0 %v1487_v1  ;;  %1397 = vmatpush3.bf16.msra.mxu1 %v1490_v2 }
 0x1f2   :  { %1023 = vmatprep.subr.bf16.mxu0 %v1493_v3  ;;  %1398 = vmatprep.subr.bf16.mxu1 %v1523_v14  ;;  %v619_v14 = vrot.slane %v602_v10, %v618_v12 }
 0x1f5   :  { %1024 = vmatpush1.bf16.msra.mxu0 %v1491_v4  ;;  %1399 = vmatpush3.bf16.msra.mxu1 %v1494_v5 }
 0x1f8   :  { %1042 = vmatmul.mubr.bf16.vlgmr.msra.gmra.mxu0 %v537_v47  ;;  %1401 = vmatmul.mubr.bf16.vlgmr.msra.gmra.mxu1 %v537_v47  ;;  %v630_v47 = vsub.s32 6, %v605_v7 }
 0x1fa   :  { %v631_v53 = vrot.slane %v602_v10, %v630_v47 }
 0x298   :  { %v961_v16 = vpop.f32.mrf.mxu0  ;;  %v1002_v17 = vpop.f32.mrf.mxu1 }
 0x299   :  { %v2107_v19 = vadd.f32 %v961_v16, %v607_v13  ;;  %v2109_v20 = vadd.f32 %v1002_v17, %v615_v15 }
 0x29a   :  { %v963_v21 = vpop.f32.mrf.mxu0  ;;  %v1004_v22 = vpop.f32.mrf.mxu1 }
 0x29b   :  { %v1090_v23 = vand.u32 2147483647, %v2107_v19  ;;  %v1092_v24 = vand.u32 2147483647, %v2109_v20  ;;  %v2113_v25 = vadd.f32 %v963_v21, %v611_v18  ;;  %v2115_v26 = vadd.f32 %v1004_v22, %v619_v14 }
 0x29c   :  { %v965_v27 = vpop.f32.mrf.mxu0  ;;  %v1006_v28 = vpop.f32.mrf.mxu1  ;;  %vm1132_vm2 = vcmp.ge.f32.partialorder %v2107_v19, 0.0  ;;  %vm1134_vm3 = vcmp.ge.f32.partialorder %v2109_v20, 0.0 }
 0x29d   :  { %v1097_v29 = vsub.f32 0.0, %v1090_v23  ;;  %v1099_v30 = vsub.f32 0.0, %v1092_v24  ;;  %v1091_v31 = vand.u32 2147483647, %v2113_v25  ;;  %v1093_v32 = vand.u32 2147483647, %v2115_v26 }
 0x29e   :  { %v966_v33 = vpop.f32.mrf.mxu0  ;;  %v1007_v34 = vpop.f32.mrf.mxu1  ;;  %vm1133_vm4 = vcmp.ge.f32.partialorder %v2113_v25, 0.0  ;;  %vm1135_vm5 = vcmp.ge.f32.partialorder %v2115_v26, 0.0 }
 0x29f   :  { %v1104_v35 = vmul.f32 1.442695, %v1097_v29  ;;  %v1108_v36 = vmul.f32 1.442695, %v1099_v30  ;;  %v1098_v37 = vsub.f32 0.0, %v1091_v31  ;;  %v1100_v38 = vsub.f32 0.0, %v1093_v32 }
 0x2a1   :  { %1495 = vpow2.f32 %v1104_v35  ;;  %v1106_v39 = vmul.f32 1.442695, %v1098_v37  ;;  %v1110_v40 = vmul.f32 1.442695, %v1100_v38 }
 0x2a2   :  { %1497 = vpow2.f32 %v1108_v36 }
 0x2a3   :  { %1499 = vpow2.f32 %v1106_v39 }
 0x2a4   :  { %1501 = vpow2.f32 %v1110_v40 }
 0x2ae   :  { %v1496_v41 = vpop.eup %1495 }
 0x2af   :  { %v1498_v42 = vpop.eup %1497  ;;  %v1118_v43 = vadd.f32 1.0, %v1496_v41 }
 0x2b0   :  { %v1120_v44 = vadd.f32 1.0, %v1498_v42  ;;  %v1500_v45 = vpop.eup %1499 }
 0x2b1   :  { %1503 = vrcp.f32 %v1118_v43  ;;  %v1502_v48 = vpop.eup %1501  ;;  %v1119_v49 = vadd.f32 1.0, %v1500_v45 }
 0x2b2   :  { %1505 = vrcp.f32 %v1120_v44  ;;  %v1121_v50 = vadd.f32 1.0, %v1502_v48 }
 0x2b3   :  { %1507 = vrcp.f32 %v1119_v49 }
 0x2b4   :  { %1509 = vrcp.f32 %v1121_v50 }
 0x2b8   :  { %v1043_v54 = vpop.f32.mrf.mxu0  ;;  %v1084_v55 = vpop.f32.mrf.mxu1 }
 0x2b9   :  { %v1044_v57 = vadd.f32 %v1043_v54, %v623_v52  ;;  %v1085_v58 = vadd.f32 %v1084_v55, %v631_v53 }
 0x2ba   :  { %v1045_v59 = vpop.f32.mrf.mxu0  ;;  %v1402_v60 = vpop.f32.mrf.mxu1 }
 0x2bb   :  { %v1094_v61 = vand.u32 2147483647, %v1044_v57  ;;  %v1096_v62 = vand.u32 2147483647, %v1085_v58  ;;  %v1046_v63 = vadd.f32 %v1045_v59, %v627_v56  ;;  %vm1136_vm6 = vcmp.ge.f32.partialorder %v1044_v57, 0.0 }
 0x2bc   :  { %v1047_v0 = vpop.f32.mrf.mxu0  ;;  %v1087_v1 = vpop.f32.mrf.mxu1  ;;  %vm1138_vm7 = vcmp.ge.f32.partialorder %v1085_v58, 0.0 }
 0x2bd   :  { %v1101_v2 = vsub.f32 0.0, %v1094_v61  ;;  %v1103_v3 = vsub.f32 0.0, %v1096_v62  ;;  %v1095_v5 = vand.u32 2147483647, %v1046_v63  ;;  %vm1137_vm8 = vcmp.ge.f32.partialorder %v1046_v63, 0.0 }
 0x2be   :  { %v1504_v4 = vpop.eup %1503  ;;  %v1048_v6 = vpop.f32.mrf.mxu0 }
 0x2bf   :  { %v1403_v7 = vpop.f32.mrf.mxu1  ;;  %v1506_v8 = vpop.eup %1505  ;;  %v1139_v9 = vmul.f32 %v1504_v4, %v1496_v41  ;;  %v1112_v11 = vmul.f32 1.442695, %v1101_v2  ;;  %v1116_v12 = vmul.f32 1.442695, %v1103_v3  ;;  %v1102_v13 = vsub.f32 0.0, %v1095_v5 }
 0x2c0   :  { %v1141_v10 = vmul.f32 %v1506_v8, %v1498_v42  ;;  %v1508_v15 = vpop.eup %1507 }
 0x2c1   :  { %v1146_v16 = vsel %vm1132_vm2, %v1504_v4, %v1139_v9  ;;  %1511 = vpow2.f32 %v1112_v11  ;;  %v1510_v17 = vpop.eup %1509  ;;  %v1140_v14 = vmul.f32 %v1508_v15, %v1500_v45  ;;  %v1114_v21 = vmul.f32 1.442695, %v1102_v13 }
 0x2c2   :  { %1153 = vst [vmem:[%s2152_s7] sm:$0xff] %v1146_v16  ;;  %v1148_v18 = vsel %vm1134_vm3, %v1506_v8, %v1141_v10  ;;  %1513 = vpow2.f32 %v1116_v12  ;;  %v1142_v19 = vmul.f32 %v1510_v17, %v1502_v48 }
 0x2c3   :  { %1155 = vst [vmem:[%s2152_s7 + $0x10] sm:$0xff] %v1148_v18  ;;  %v1147_v22 = vsel %vm1133_vm4, %v1508_v15, %v1140_v14  ;;  %1515 = vpow2.f32 %v1114_v21 }
 0x2c4   :  { %1154 = vst [vmem:[%s2152_s7 + $0x8] sm:$0xff] %v1147_v22  ;;  %v1149_v20 = vsel %vm1135_vm5, %v1510_v17, %v1142_v19 }
 0x2c5   :  { %1156 = vst [vmem:[%s2152_s7 + $0x18] sm:$0xff] %v1149_v20 }
 0x2ce   :  { %v1512_v23 = vpop.eup %1511 }
 0x2cf   :  { %v1514_v24 = vpop.eup %1513  ;;  %v1122_v27 = vadd.f32 1.0, %v1512_v23 }
 0x2d0   :  { %v1124_v28 = vadd.f32 1.0, %v1514_v24  ;;  %v1516_v29 = vpop.eup %1515 }
 0x2d1   :  { %1517 = vrcp.f32 %v1122_v27  ;;  %v1123_v25 = vadd.f32 1.0, %v1516_v29 }
 0x2d2   :  { %1519 = vrcp.f32 %v1124_v28 }
 0x2d3   :  { %1521 = vrcp.f32 %v1123_v25 }
 0x2de   :  { %v1518_v26 = vpop.eup %1517 }
 0x2df   :  { %v1520_v30 = vpop.eup %1519  ;;  %v1143_v31 = vmul.f32 %v1518_v26, %v1512_v23 }
 0x2e0   :  { %v1145_v32 = vmul.f32 %v1520_v30, %v1514_v24  ;;  %v1522_v33 = vpop.eup %1521 }
 0x2e1   :  { %v1150_v34 = vsel %vm1136_vm6, %v1518_v26, %v1143_v31  ;;  %v1144_v36 = vmul.f32 %v1522_v33, %v1516_v29 }
 0x2e2   :  { %1157 = vst [vmem:[%s2152_s7 + $0x20] sm:$0xff] %v1150_v34  ;;  %v1152_v35 = vsel %vm1138_vm7, %v1520_v30, %v1145_v32 }
 0x2e3   :  { %1159 = vst.msk [vmem:[%s2152_s7 + $0x30] sm:$0xff] %vm139_vm0, %v1152_v35  ;;  %v1151_v37 = vsel %vm1137_vm8, %v1522_v33, %v1144_v36 }
 0x2e4   :  { %1158 = vst [vmem:[%s2152_s7 + $0x28] sm:$0xff] %v1151_v37 }

</bundles_post_ra>
